<compile_context>
chip_gen: v5e
topology: v5e:2x2
jax: 0.10.0
libtpu: 0.0.40
codegen_flags: <defaults>
</compile_context>

<pallas_src>
import functools

import jax
import jax.numpy as jnp
from jax.experimental import pallas as pl
from jax.experimental.pallas import tpu as pltpu


def _pick_tile(n, target, align):
    """Largest multiple of `align` that divides `n` and is <= `target`.

    Falls back to the full dimension (always a legal BlockSpec choice)."""
    if n <= target or n % align != 0:
        return n
    t = (min(target, n) // align) * align
    while t >= align:
        if n % t == 0:
            return t
        t -= align
    return n


def _scale_kernel(x_ref, w1_ref, b1_ref, w2_ref, b2_ref, s_ref, acc_ref, *, length):
    """Global-average-pool over L (accumulated across the L grid axis), then
    fc1 -> relu -> fc2 -> sigmoid, all in column form.

    x_ref : (1, C, TL)   current (batch, L-tile) slab of the input
    w1_ref: (H, C)  b1_ref: (H, 1)  w2_ref: (C, H)  b2_ref: (C, 1)   (VMEM-resident)
    s_ref : (1, C, 1)    float32 per-(batch, channel) sigmoid gate
    acc_ref: (C, 1)      float32 running sum over L (scratch)
    """
    l = pl.program_id(1)

    @pl.when(l == 0)
    def _():
        acc_ref[...] = jnp.zeros_like(acc_ref)

    # Partial sum over the length axis, accumulated in float32 without ever
    # materializing a persistent f32 copy of x.
    acc_ref[...] += jnp.sum(x_ref[0], axis=1, keepdims=True, dtype=jnp.float32)

    @pl.when(l == pl.num_programs(1) - 1)
    def _():
        pooled = acc_ref[...] * (1.0 / float(length))                    # (C, 1) f32
        h = jnp.dot(w1_ref[...], pooled,
                    preferred_element_type=jnp.float32) + b1_ref[...]    # (H, 1)
        h = jnp.maximum(h, 0.0)
        z = jnp.dot(w2_ref[...], h,
                    preferred_element_type=jnp.float32) + b2_ref[...]    # (C, 1)
        s_ref[...] = jax.nn.sigmoid(z)[None]                             # (1, C, 1)


def _gate_kernel(x_ref, s_ref, o_ref):
    """out = x * s, broadcast over the length (lane) axis.

    Only the tiny (1, TC, 1) scale is cast to the I/O dtype; the x tile is
    multiplied in its native dtype (bf16 is native on the VPU for v6e/v7x).
    """
    o_ref[...] = x_ref[...] * s_ref[...].astype(o_ref.dtype)


def attention_module(x, w1, b1, w2, b2):
    """x: (B, C, L); w1: (C//4, C) [PyTorch (out, in)]; b1: (C//4,);
       w2: (C, C//4); b2: (C,).  Returns x * sigmoid(MLP(mean_L(x)))."""
    B, C, L = x.shape
    H = w1.shape[0]
    itemsize = jnp.dtype(x.dtype).itemsize

    b1_col = b1.reshape(H, 1).astype(jnp.float32)
    b2_col = b2.reshape(C, 1).astype(jnp.float32)

    # ---------------- pass 1: per-(batch, channel) sigmoid gate ----------------
    # Keep each (C, TL) input slab around <= 4 MiB so the double-buffered
    # pipeline fits comfortably in scoped VMEM even on v7x.
    tl_pool = _pick_tile(L, max(128, (4 * 1024 * 1024) // max(C * itemsize, 1)), 128)
    n_l_pool = L // tl_pool
    weight_bytes = (H * C + C * H + H + C) * 4

    s = pl.pallas_call(
        functools.partial(_scale_kernel, length=L),
        out_shape=jax.ShapeDtypeStruct((B, C, 1), jnp.float32),
        grid_spec=pltpu.PrefetchScalarGridSpec(
            num_scalar_prefetch=0,
            grid=(B, n_l_pool),
            in_specs=[
                pl.BlockSpec((1, C, tl_pool), lambda b, l: (b, 0, l)),
                # Constant index maps -> weights/biases DMA'd once, stay resident.
                pl.BlockSpec((H, C), lambda b, l: (0, 0)),
                pl.BlockSpec((H, 1), lambda b, l: (0, 0)),
                pl.BlockSpec((C, H), lambda b, l: (0, 0)),
                pl.BlockSpec((C, 1), lambda b, l: (0, 0)),
            ],
            out_specs=pl.BlockSpec((1, C, 1), lambda b, l: (b, 0, 0)),
            scratch_shapes=[pltpu.VMEM((C, 1), jnp.float32)],
        ),
        compiler_params=pltpu.CompilerParams(
            dimension_semantics=("parallel", "arbitrary")),
        cost_estimate=pl.CostEstimate(
            flops=B * C * L + 4 * B * C * H,
            bytes_accessed=B * C * L * itemsize + weight_bytes + B * C * 4,
            transcendentals=B * C),
    )(x, w1, b1_col, w2, b2_col)

    # ---------------- pass 2: gate the input, tiled over (B, C, L) -------------
    tc = _pick_tile(C, 256, 8)
    tl = _pick_tile(L, 512, 128)

    out = pl.pallas_call(
        _gate_kernel,
        out_shape=jax.ShapeDtypeStruct((B, C, L), x.dtype),
        grid_spec=pltpu.PrefetchScalarGridSpec(
            num_scalar_prefetch=0,
            grid=(B, C // tc, L // tl),
            in_specs=[
                pl.BlockSpec((1, tc, tl), lambda b, c, l: (b, c, l)),
                pl.BlockSpec((1, tc, 1), lambda b, c, l: (b, c, 0)),
            ],
            out_specs=pl.BlockSpec((1, tc, tl), lambda b, c, l: (b, c, l)),
        ),
        compiler_params=pltpu.CompilerParams(
            dimension_semantics=("parallel", "parallel", "parallel")),
        cost_estimate=pl.CostEstimate(
            flops=B * C * L,
            bytes_accessed=2 * B * C * L * itemsize + B * C * 4,
            transcendentals=0),
    )(x, s)
    return out


def attention_module_ref(x, w1, b1, w2, b2):
    pooled = jnp.mean(x, axis=2)
    h = jnp.maximum(pooled @ w1.T + b1, 0.0)
    s = jax.nn.sigmoid(h @ w2.T + b2)
    return x * s[:, :, None]


if __name__ == "__main__":
    B, C, L = 2, 32, 16          # in_dim = C = 32, hidden = C // 4 = 8
    key = jax.random.PRNGKey(0)
    kx, k1, k2, k3, k4 = jax.random.split(key, 5)

    x = jax.random.normal(kx, (B, C, L), dtype=jnp.float32)

    # Deterministic parameter init (PyTorch Linear-style uniform bounds).
    bound1 = 1.0 / (C ** 0.5)
    w1 = jax.random.uniform(k1, (C // 4, C), jnp.float32, -bound1, bound1)
    b1 = jax.random.uniform(k2, (C // 4,), jnp.float32, -bound1, bound1)
    bound2 = 1.0 / ((C // 4) ** 0.5)
    w2 = jax.random.uniform(k3, (C, C // 4), jnp.float32, -bound2, bound2)
    b2 = jax.random.uniform(k4, (C,), jnp.float32, -bound2, bound2)

    out = attention_module(x, w1, b1, w2, b2)
    jax.block_until_ready(out)

    ref = attention_module_ref(x, w1, b1, w2, b2)
    assert out.shape == (B, C, L)
    assert jnp.allclose(out, ref, atol=1e-5, rtol=1e-5)

    print("KERNEL_OK")
</pallas_src>

<mosaic_0001>
module attributes {stable_mosaic.version = 11 : i64} {
  func.func @_scale_kernel(%arg0: i32, %arg1: i32, %arg2: memref<1x32x16xf32, #tpu.memory_space<vmem>>, %arg3: memref<8x32xf32, #tpu.memory_space<vmem>>, %arg4: memref<8x1xf32, #tpu.memory_space<vmem>>, %arg5: memref<32x8xf32, #tpu.memory_space<vmem>>, %arg6: memref<32x1xf32, #tpu.memory_space<vmem>>, %arg7: memref<1x32x1xf32, #tpu.memory_space<vmem>>, %arg8: memref<32x1xf32, #tpu.memory_space<vmem>>) attributes {dimension_semantics = [#tpu.dimension_semantics<parallel>, #tpu.dimension_semantics<arbitrary>], iteration_bounds = array<i64: 2, 1>, scalar_prefetch = 0 : i64, scratch_operands = 1 : i64, tpu.core_type = #tpu.core_type<tc>, window_params = [{transform_indices = @transform_0, window_bounds = array<i64: 1, 32, 16>}, {pipeline_mode = #tpu.pipeline_mode<synchronous>, transform_indices = @transform_1, window_bounds = array<i64: 8, 32>}, {pipeline_mode = #tpu.pipeline_mode<synchronous>, transform_indices = @transform_2, window_bounds = array<i64: 8, 1>}, {pipeline_mode = #tpu.pipeline_mode<synchronous>, transform_indices = @transform_3, window_bounds = array<i64: 32, 8>}, {pipeline_mode = #tpu.pipeline_mode<synchronous>, transform_indices = @transform_4, window_bounds = array<i64: 32, 1>}, {transform_indices = @transform_5, window_bounds = array<i64: 1, 32, 1>}]} {
    %c0_i32 = arith.constant 0 : i32
    %0 = arith.cmpi eq, %arg1, %c0_i32 : i32
    %1 = arith.extui %0 : i1 to i32
    %c0_i32_0 = arith.constant 0 : i32
    %2 = arith.cmpi ne, %1, %c0_i32_0 : i32
    scf.if %2 {
      %cst_9 = arith.constant 0.000000e+00 : f32
      %13 = vector.broadcast %cst_9 : f32 to vector<32x1xf32>
      %c0_10 = arith.constant 0 : index
      %c0_11 = arith.constant 0 : index
      %14 = vector.load %arg8[%c0_10, %c0_11] : memref<32x1xf32, #tpu.memory_space<vmem>>, vector<32x1xf32>
      tpu.vector_store %arg8[%c0_10, %c0_11], %13 {strides = array<i32>} : memref<32x1xf32, #tpu.memory_space<vmem>>, vector<32x1xf32>,
    } else {
    }
    %c0 = arith.constant 0 : index
    %c0_1 = arith.constant 0 : index
    %3 = vector.load %arg8[%c0, %c0_1] : memref<32x1xf32, #tpu.memory_space<vmem>>, vector<32x1xf32>
    %c0_2 = arith.constant 0 : index
    %c0_3 = arith.constant 0 : index
    %c0_4 = arith.constant 0 : index
    %4 = vector.load %arg2[%c0_2, %c0_3, %c0_4] : memref<1x32x16xf32, #tpu.memory_space<vmem>>, vector<1x32x16xf32>
    %5 = vector.shape_cast %4 : vector<1x32x16xf32> to vector<32x16xf32>
    %cst = arith.constant dense<0.000000e+00> : vector<32xf32>
    %6 = vector.multi_reduction <add>, %5, %cst [1] : vector<32x16xf32> to vector<32xf32>
    %7 = vector.shape_cast %6 : vector<32xf32> to vector<32x1xf32>
    %8 = arith.addf %3, %7 : vector<32x1xf32>
    %c0_5 = arith.constant 0 : index
    %c0_6 = arith.constant 0 : index
    %9 = vector.load %arg8[%c0_5, %c0_6] : memref<32x1xf32, #tpu.memory_space<vmem>>, vector<32x1xf32>
    tpu.vector_store %arg8[%c0_5, %c0_6], %8 {strides = array<i32>} : memref<32x1xf32, #tpu.memory_space<vmem>>, vector<32x1xf32>,
    %c0_i32_7 = arith.constant 0 : i32
    %10 = arith.cmpi eq, %arg1, %c0_i32_7 : i32
    %11 = arith.extui %10 : i1 to i32
    %c0_i32_8 = arith.constant 0 : i32
    %12 = arith.cmpi ne, %11, %c0_i32_8 : i32
    scf.if %12 {
      %c0_9 = arith.constant 0 : index
      %c0_10 = arith.constant 0 : index
      %13 = vector.load %arg8[%c0_9, %c0_10] : memref<32x1xf32, #tpu.memory_space<vmem>>, vector<32x1xf32>
      %cst_11 = arith.constant 6.250000e-02 : f32
      %14 = vector.broadcast %cst_11 : f32 to vector<32x1xf32>
      %15 = arith.mulf %13, %14 : vector<32x1xf32>
      %c0_12 = arith.constant 0 : index
      %c0_13 = arith.constant 0 : index
      %16 = vector.load %arg3[%c0_12, %c0_13] : memref<8x32xf32, #tpu.memory_space<vmem>>, vector<8x32xf32>
      %cst_14 = arith.constant dense<0.000000e+00> : vector<8x1xf32>
      %17 = tpu.matmul %16, %15, %cst_14 {dimension_numbers = #tpu.dot_dimension_numbers<[1], [0], [0], [1], [0, 0, 1, 1], [], []>} : vector<8x32xf32>, vector<32x1xf32>, vector<8x1xf32> -> vector<8x1xf32>
      %c0_15 = arith.constant 0 : index
      %c0_16 = arith.constant 0 : index
      %18 = vector.load %arg4[%c0_15, %c0_16] : memref<8x1xf32, #tpu.memory_space<vmem>>, vector<8x1xf32>
      %19 = arith.addf %17, %18 : vector<8x1xf32>
      %cst_17 = arith.constant 0.000000e+00 : f32
      %20 = vector.broadcast %cst_17 : f32 to vector<8x1xf32>
      %21 = arith.maximumf %19, %20 : vector<8x1xf32>
      %c0_18 = arith.constant 0 : index
      %c0_19 = arith.constant 0 : index
      %22 = vector.load %arg5[%c0_18, %c0_19] : memref<32x8xf32, #tpu.memory_space<vmem>>, vector<32x8xf32>
      %cst_20 = arith.constant dense<0.000000e+00> : vector<32x1xf32>
      %23 = tpu.matmul %22, %21, %cst_20 {dimension_numbers = #tpu.dot_dimension_numbers<[1], [0], [0], [1], [0, 0, 1, 1], [], []>} : vector<32x8xf32>, vector<8x1xf32>, vector<32x1xf32> -> vector<32x1xf32>
      %c0_21 = arith.constant 0 : index
      %c0_22 = arith.constant 0 : index
      %24 = vector.load %arg6[%c0_21, %c0_22] : memref<32x1xf32, #tpu.memory_space<vmem>>, vector<32x1xf32>
      %25 = arith.addf %23, %24 : vector<32x1xf32>
      %26 = arith.negf %25 : vector<32x1xf32>
      %27 = math.exp %26 : vector<32x1xf32>
      %cst_23 = arith.constant 1.000000e+00 : f32
      %28 = vector.broadcast %cst_23 : f32 to vector<32x1xf32>
      %29 = arith.addf %28, %27 : vector<32x1xf32>
      %30 = arith.divf %28, %29 : vector<32x1xf32>
      %31 = vector.shape_cast %30 : vector<32x1xf32> to vector<1x32x1xf32>
      %c0_24 = arith.constant 0 : index
      %c0_25 = arith.constant 0 : index
      %c0_26 = arith.constant 0 : index
      %32 = vector.load %arg7[%c0_24, %c0_25, %c0_26] : memref<1x32x1xf32, #tpu.memory_space<vmem>>, vector<1x32x1xf32>
      tpu.vector_store %arg7[%c0_24, %c0_25, %c0_26], %31 {strides = array<i32>} : memref<1x32x1xf32, #tpu.memory_space<vmem>>, vector<1x32x1xf32>,
    } else {
    }
    return
  }
  func.func @transform_0(%arg0: i32, %arg1: i32) -> (i32, i32, i32) {
    %c0_i32 = arith.constant 0 : i32
    %c0_i32_0 = arith.constant 0 : i32
    return %arg0, %c0_i32, %arg1 : i32, i32, i32
  }
  func.func @transform_1(%arg0: i32, %arg1: i32) -> (i32, i32) {
    %c0_i32 = arith.constant 0 : i32
    %c0_i32_0 = arith.constant 0 : i32
    %c0_i32_1 = arith.constant 0 : i32
    return %c0_i32, %c0_i32_0 : i32, i32
  }
  func.func @transform_2(%arg0: i32, %arg1: i32) -> (i32, i32) {
    %c0_i32 = arith.constant 0 : i32
    %c0_i32_0 = arith.constant 0 : i32
    %c0_i32_1 = arith.constant 0 : i32
    return %c0_i32, %c0_i32_0 : i32, i32
  }
  func.func @transform_3(%arg0: i32, %arg1: i32) -> (i32, i32) {
    %c0_i32 = arith.constant 0 : i32
    %c0_i32_0 = arith.constant 0 : i32
    %c0_i32_1 = arith.constant 0 : i32
    return %c0_i32, %c0_i32_0 : i32, i32
  }
  func.func @transform_4(%arg0: i32, %arg1: i32) -> (i32, i32) {
    %c0_i32 = arith.constant 0 : i32
    %c0_i32_0 = arith.constant 0 : i32
    %c0_i32_1 = arith.constant 0 : i32
    return %c0_i32, %c0_i32_0 : i32, i32
  }
  func.func @transform_5(%arg0: i32, %arg1: i32) -> (i32, i32, i32) {
    %c0_i32 = arith.constant 0 : i32
    %c0_i32_0 = arith.constant 0 : i32
    %c0_i32_1 = arith.constant 0 : i32
    return %arg0, %c0_i32, %c0_i32_0 : i32, i32, i32
  }
}

</mosaic_0001>

<bundles_post_ra>
// kernel: tpu_custom_call.1
= control target key start
LH: loop header
LB: loop body
LE: loop exit
PB: predicated region body
PF: predicated region fallthrough
CT: control target
= control target key end

     0   :  { %s644_s18 = smov 0   ;;  %s646_s19 = smov 0   ;;  %s739_s0 = inlined_call_operand.vmem [shape: f32[2,32,16], index: 0, kind: input, shape index: {}]   ;;  %s740_s1 = inlined_call_operand.vmem [shape: f32[8,32], index: 1, kind: input, shape index: {}]   ;;  %s741_s2 = inlined_call_operand.vmem [shape: f32[8,1], index: 2, kind: input, shape index: {}]   ;;  %s742_s3 = inlined_call_operand.vmem [shape: f32[32,8], index: 3, kind: input, shape index: {}]   ;;  %s743_s4 = inlined_call_operand.vmem [shape: f32[32,1], index: 4, kind: input, shape index: {}]   ;;  %s744_s5 = inlined_call_operand.vmem [shape: f32[2,32,1], index: 5, kind: output, shape index: {}]  }
   0x1   :  { %s648_s20 = smov 0  }
   0x2 LB: > { %s27_s21 = sadd.s32 1, %s607_s19  ;;  %p528_p0 = scmp.ge.s32.totalorder %s611_s20, 1  ;;  %s611_s20 = sphi %s648_s20, %s15_s20   ;;  %s607_s19 = sphi %s646_s19, %s748_s19   ;;  %s603_s18 = sphi %s644_s18, %s747_s18  }
   0x3   : > { %p29_p1 = scmp.ge.s32.totalorder %s27_s21, 2  ;;  %p204_p2 = scmp.lt.s32.totalorder %s611_s20, 3 }
   0x5   : > { %s750_s21 = smov (%p29_p1, %s27_s21), 0  ;;  %p205_p3 = pnand %p528_p0, %p204_p2 }
   0x6   : > { %p235_p4 = scmp.lt.s32.totalorder (!%p205_p3), %s603_s18, 1 }
   0x7   : > { %208 = sbr.rel (%p205_p3) target bundleno = 463 (0x1cf), region = 40 }
   0xc   : > { %vm252_vm0 = vcmask 7168   ;;  %v613_v0 = vmov 0.0   ;;  %s752_s18 = smov (!%p235_p4, %s603_s18), 1  ;;  %vm265_vm1 = vcmask 130048   ;;  %v298_v29 = vld [vmem:[%s740_s1] sm:$0xff]  ;;  %vm300_vm2 = vcmask 261120  }
   0xd   : > { %256 = vst.msk [vmem:[#allocation2 + $0x18] sm:$0xff] %vm252_vm0, %v613_v0  ;;  %s544_s22 = sshll.u32 %s752_s18, 5  ;;  %v299_v30 = vld [vmem:[%s741_s2] sm:$0xff]  ;;  %v326_v34 = vld [vmem:[%s742_s3 + $0x8] sm:$0xff]  ;;  %vm333_vm3 = vcmask 64512   ;;  %v328_v35 = vld [vmem:[%s742_s3 + $0x18] sm:$0xff] }
   0xe   : > { %253 = vst.msk [vmem:[#allocation2] sm:$0xff] %vm252_vm0, %v613_v0  ;;  %s242_s25 = scalar_lea.vmem %s739_s0, %s544_s22  ;;  %v325_v36 = vld [vmem:[%s742_s3] sm:$0xff]  ;;  %v327_v37 = vld [vmem:[%s742_s3 + $0x10] sm:$0xff]  ;;  %v330_v42 = vld [vmem:[%s743_s4 + $0x8] sm:$0xff]  ;;  %s717_s28 = scalar_lea.vmem %s744_s5, %s544_s22 }
   0xf   : > { %254 = vst.msk [vmem:[#allocation2 + $0x8] sm:$0xff] %vm252_vm0, %v613_v0  ;;  %v264_v1 = vld [vmem:[%s242_s25 + $0x18] sm:$0xff]  ;;  %v262_v2 = vld [vmem:[%s242_s25 + $0x8] sm:$0xff]  ;;  %v263_v5 = vld [vmem:[%s242_s25 + $0x10] sm:$0xff] }
  0x10   : > { %255 = vst.msk [vmem:[#allocation2 + $0x10] sm:$0xff] %vm252_vm0, %v613_v0  ;;  %v275_v3 = vsel %vm265_vm1, %v264_v1, 0.0  ;;  %v269_v4 = vsel %vm265_vm1, %v262_v2, 0.0  ;;  %v261_v6 = vld [vmem:[%s242_s25] sm:$0xff]  ;;  %v272_v7 = vsel %vm265_vm1, %v263_v5, 0.0  ;;  %v332_v43 = vld [vmem:[%s743_s4 + $0x18] sm:$0xff] }
  0x11   : > { %276 = vadd.xlane.f32.xlu0 %v275_v3  ;;  %270 = vadd.xlane.f32.xlu1 %v269_v4  ;;  %v266_v8 = vsel %vm265_vm1, %v261_v6, 0.0  ;;  %v329_v38 = vld [vmem:[%s743_s4] sm:$0xff]  ;;  %v331_v52 = vld [vmem:[%s743_s4 + $0x10] sm:$0xff] }
  0x14   : > { %v260_v9 = vld [vmem:[#allocation2 + $0x18] sm:$0xff] }
  0x15   : > { %v257_v16 = vld [vmem:[#allocation2] sm:$0xff] }
  0x16   : > { %v258_v10 = vld [vmem:[#allocation2 + $0x8] sm:$0xff] }
  0x17   : > { %v259_v15 = vld [vmem:[#allocation2 + $0x10] sm:$0xff] }
  0x19   : > { %273 = vadd.xlane.f32.xlu0 %v272_v7  ;;  %267 = vadd.xlane.f32.xlu1 %v266_v8 }
  0x84   : > { %v277_v11 = vpop.xlane.xlu0 %276  ;;  %v271_v12 = vpop.xlane.xlu1 %270 }
  0x85   : > { %v281_v13 = vadd.f32 %v277_v11, %v260_v9  ;;  %v279_v14 = vadd.f32 %v271_v12, %v258_v10 }
  0x87   : > { %286 = vst.msk [vmem:[#allocation2 + $0x18] sm:$0xff] %vm252_vm0, %v281_v13 }
  0x88   : > { %284 = vst.msk [vmem:[#allocation2 + $0x8] sm:$0xff] %vm252_vm0, %v279_v14 }
  0x8c   : > { %v274_v17 = vpop.xlane.xlu0 %273  ;;  %v268_v18 = vpop.xlane.xlu1 %267 }
  0x8d   : > { %v280_v19 = vadd.f32 %v274_v17, %v259_v15  ;;  %v278_v20 = vadd.f32 %v268_v18, %v257_v16 }
  0x8e   : > { %v293_v21 = vld [vmem:[#allocation2 + $0x18] sm:$0xff] }
  0x8f   : > { %285 = vst.msk [vmem:[#allocation2 + $0x10] sm:$0xff] %vm252_vm0, %v280_v19  ;;  %v297_v22 = vmul.f32 0.0625, %v293_v21  ;;  %v291_v24 = vld [vmem:[#allocation2 + $0x8] sm:$0xff] }
  0x90   : > { %283 = vst.msk [vmem:[#allocation2] sm:$0xff] %vm252_vm0, %v278_v20  ;;  %v295_v27 = vmul.f32 0.0625, %v291_v24 }
  0x91   : > { %316 = vmatpush.msra.mxu0 %v297_v22 }
  0x96   : > { %v292_v23 = vld [vmem:[#allocation2 + $0x10] sm:$0xff] }
  0x97   : > { %v296_v25 = vmul.f32 0.0625, %v292_v23  ;;  %v290_v26 = vld [vmem:[#allocation2] sm:$0xff] }
  0x98   : > { %v294_v28 = vmul.f32 0.0625, %v290_v26 }
  0x99   : > { %317 = vmatpush.msra.mxu0 %v296_v25 }
  0x9b   : > { %318 = vmatpush.msra.mxu0 %v295_v27 }
  0x9d   : > { %319 = vmatpush.msra.mxu0 %v294_v28 }
  0x9e   : > { %533 = vmatmul.msk.f32.vlgmr.msra.gmra.mxu0 %vm300_vm2, %v298_v29 }
 0x11b   : > { %v321_v31 = vpop.f32.mrf.mxu0 }
 0x11c   : > { %v322_v32 = vadd.f32 %v321_v31, %v299_v30 }
 0x11e   : > { %v324_v33 = vmax.f32 %v322_v32, 0.0 }
 0x120   : > { %361 = vmatpush.msra.mxu1 %v324_v33  ;;  %546 = vmatpush.msra.mxu2 %v324_v33 }
 0x121   : > { %547 = vmatpush.msra.mxu3 %v324_v33  ;;  %535 = vmatmul.msk.f32.vlgmr.msra.gmra.mxu2 %vm333_vm3, %v326_v34 }
 0x122   : > { %537 = vmatmul.msk.f32.vlgmr.msra.gmra.mxu3 %vm333_vm3, %v328_v35  ;;  %534 = vmatmul.msk.f32.vlgmr.msra.gmra.mxu1 %vm333_vm3, %v325_v36 }
 0x129   : > { %536 = vmatmul.msk.f32.gmra.mxu2 %vm333_vm3, %v327_v37 }
 0x19f   : > { %v363_v39 = vpop.f32.mrf.mxu1 }
 0x1a0   : > { %v364_v40 = vadd.f32 %v363_v39, %v329_v38 }
 0x1a2   : > { %v538_v41 = vmul.f32 -1.442695, %v364_v40 }
 0x1a4   : > { %573 = vpow2.f32 %v538_v41  ;;  %v366_v44 = vpop.f32.mrf.mxu2 }
 0x1a5   : > { %v367_v45 = vadd.f32 %v366_v44, %v330_v42  ;;  %v372_v46 = vpop.f32.mrf.mxu3 }
 0x1a6   : > { %v373_v47 = vadd.f32 %v372_v46, %v332_v43 }
 0x1a7   : > { %v539_v48 = vmul.f32 -1.442695, %v367_v45 }
 0x1a8   : > { %v541_v49 = vmul.f32 -1.442695, %v373_v47 }
 0x1a9   : > { %575 = vpow2.f32 %v539_v48 }
 0x1aa   : > { %v574_v50 = vpop.eup %573  ;;  %577 = vpow2.f32 %v541_v49 }
 0x1ab   : > { %v387_v51 = vadd.f32 1.0, %v574_v50 }
 0x1ac   : > { %v369_v53 = vpop.f32.mrf.mxu2 }
 0x1ad   : > { %579 = vrcp.f32 %v387_v51  ;;  %v370_v54 = vadd.f32 %v369_v53, %v331_v52  ;;  %v402_v62 = vand.u32 2147483648, %v387_v51  ;;  %vm396_vm4 = vweird.f32 %v387_v51 }
 0x1ae   : > { %v400_v0 = vand.u32 2147483647, %v387_v51 }
 0x1af   : > { %v576_v55 = vpop.eup %575  ;;  %v540_v59 = vmul.f32 -1.442695, %v370_v54  ;;  %v403_v5 = vor.u32 1.1754944e-38, %v402_v62 }
 0x1b0   : > { %v578_v56 = vpop.eup %577  ;;  %v388_v57 = vadd.f32 1.0, %v576_v55  ;;  %vm401_vm7 = vcmp.eq.f32.partialorder %v400_v0, 8.507059e+37 }
 0x1b1   : > { %v390_v58 = vadd.f32 1.0, %v578_v56 }
 0x1b2   : > { %581 = vrcp.f32 %v388_v57  ;;  %v415_v11 = vand.u32 2147483647, %v388_v57  ;;  %v417_v12 = vand.u32 2147483648, %v388_v57  ;;  %vm411_vm11 = vweird.f32 %v388_v57 }
 0x1b3   : > { %v580_v60 = vpop.eup %579  ;;  %583 = vrcp.f32 %v390_v58  ;;  %vm441_vm8 = vweird.f32 %v390_v58  ;;  %v447_v18 = vand.u32 2147483648, %v390_v58  ;;  %v445_v20 = vand.u32 2147483647, %v390_v58 }
 0x1b4   : > { %v392_v61 = vmul.f32 %v580_v60, %v387_v51  ;;  %585 = vpow2.f32 %v540_v59  ;;  %vm397_vm5 = vweird.f32 %v580_v60  ;;  %v418_v22 = vor.u32 1.1754944e-38, %v417_v12 }
 0x1b5   : > { %vm708_vm6 = vmor %vm396_vm4, %vm397_vm5  ;;  %vm416_vm13 = vcmp.eq.f32.partialorder %v415_v11, 8.507059e+37  ;;  %v448_v25 = vor.u32 1.1754944e-38, %v447_v18  ;;  %vm446_vm15 = vcmp.eq.f32.partialorder %v445_v20, 8.507059e+37 }
 0x1b6   : > { %v393_v63 = vsub.f32 1.0, %v392_v61 }
 0x1b8   : > { %v582_v1 = vpop.eup %581  ;;  %v394_v2 = vmul.f32 %v580_v60, %v393_v63 }
 0x1b9   : > { %v584_v3 = vpop.eup %583  ;;  %v407_v6 = vmul.f32 %v582_v1, %v388_v57  ;;  %vm412_vm9 = vweird.f32 %v582_v1 }
 0x1ba   : > { %v395_v7 = vadd.f32 %v580_v60, %v394_v2  ;;  %v437_v8 = vmul.f32 %v584_v3, %v390_v58  ;;  %v586_v9 = vpop.eup %585  ;;  %vm442_vm10 = vweird.f32 %v584_v3  ;;  %vm413_vm12 = vmor %vm411_vm11, %vm412_vm9 }
 0x1bb   : > { %v408_v10 = vsub.f32 1.0, %v407_v6  ;;  %v389_v15 = vadd.f32 1.0, %v586_v9  ;;  %vm443_vm14 = vmor %vm441_vm8, %vm442_vm10 }
 0x1bc   : > { %v399_v13 = vsel %vm708_vm6, %v580_v60, %v395_v7  ;;  %v438_v14 = vsub.f32 1.0, %v437_v8 }
 0x1bd   : > { %v404_v16 = vsel %vm401_vm7, %v403_v5, %v399_v13  ;;  %v409_v17 = vmul.f32 %v582_v1, %v408_v10  ;;  %587 = vrcp.f32 %v389_v15  ;;  %v432_v32 = vand.u32 2147483648, %v389_v15 }
 0x1be   : > { %451 = vst.msk [vmem:[%s717_s28] sm:$0xff] %vm252_vm0, %v404_v16  ;;  %v439_v19 = vmul.f32 %v584_v3, %v438_v14  ;;  %v430_v34 = vand.u32 2147483647, %v389_v15  ;;  %vm426_vm2 = vweird.f32 %v389_v15 }
 0x1bf   : > { %v410_v21 = vadd.f32 %v582_v1, %v409_v17  ;;  %v433_v36 = vor.u32 1.1754944e-38, %v432_v32 }
 0x1c0   : > { %v440_v23 = vadd.f32 %v584_v3, %v439_v19  ;;  %vm431_vm4 = vcmp.eq.f32.partialorder %v430_v34, 8.507059e+37 }
 0x1c1   : > { %v414_v24 = vsel %vm413_vm12, %v582_v1, %v410_v21 }
 0x1c2   : > { %v419_v26 = vsel %vm416_vm13, %v418_v22, %v414_v24  ;;  %v444_v27 = vsel %vm443_vm14, %v584_v3, %v440_v23 }
 0x1c3   : > { %452 = vst.msk [vmem:[%s717_s28 + $0x8] sm:$0xff] %vm252_vm0, %v419_v26  ;;  %v449_v28 = vsel %vm446_vm15, %v448_v25, %v444_v27  ;;  %v588_v29 = vpop.eup %587 }
 0x1c4   : > { %454 = vst.msk [vmem:[%s717_s28 + $0x18] sm:$0xff] %vm252_vm0, %v449_v28  ;;  %v422_v30 = vmul.f32 %v588_v29, %v389_v15  ;;  %vm427_vm1 = vweird.f32 %v588_v29 }
 0x1c5   : > { %vm428_vm3 = vmor %vm426_vm2, %vm427_vm1 }
 0x1c6   : > { %v423_v31 = vsub.f32 1.0, %v422_v30 }
 0x1c8   : > { %v424_v33 = vmul.f32 %v588_v29, %v423_v31 }
 0x1ca   : > { %v425_v35 = vadd.f32 %v588_v29, %v424_v33 }
 0x1cc   : > { %v429_v37 = vsel %vm428_vm3, %v588_v29, %v425_v35 }
 0x1cd   : > { %v434_v38 = vsel %vm431_vm4, %v433_v36, %v429_v37 }
 0x1ce   : > { %453 = vst.msk [vmem:[%s717_s28 + $0x10] sm:$0xff] %vm252_vm0, %v434_v38 }
 0x1cf PF: > { %s15_s20 = sadd.s32 1, %s611_s20   ;;  %s747_s18 = smov %s607_s19 }
 0x1d0   : > { %p12_p5 = scmp.ge.s32.totalorder %s15_s20, 4   ;;  %s748_s19 = smov %s750_s21 }
 0x1d2   :  { %14 = sbr.rel (!%p12_p5) target bundleno = 2 (0x2), region = 78 }

</bundles_post_ra>
